<compile_context>
chip_gen: v7x
topology: tpu7x:2x2x1
jax: 0.10.0
libtpu: 0.0.40
codegen_flags: <defaults>
</compile_context>

<pallas_src>
import jax
import jax.numpy as jnp
from jax.experimental import pallas as pl
from jax.experimental.pallas import tpu as pltpu


def _make_fold_kernel(rows: int, G: int, P: int, use_dynamic_loop: bool):
    """Build the fold body copying (rows*G, C, P, P) patches -> (C, rows*P, G*P)."""
    # Lane-dense store grouping: when P < 128, concatenate K adjacent patches
    # along the lane axis so each store covers min(G, 128//P)*P lanes
    # (a full 128 lanes whenever P | 128 and G >= 128/P).
    if P >= 128:
        K = 1
    else:
        K = max(1, min(G, 128 // P))
        while G % K != 0:
            K -= 1

    def fold_kernel(x_ref, o_ref):
        # x_ref: (rows*G, C, P, P)   -- `rows` full rows of G patches, token-major
        # o_ref: (C, rows*P, W)      -- horizontal slab of the output image
        if use_dynamic_loop:
            # Many 128-aligned patches per step: dynamic loop bounds code size and
            # vreg live ranges; every store is an unmasked 128-lane-aligned block.
            @pl.loop(0, rows * G)
            def _(idx):
                r = idx // G
                gj = idx - r * G
                row_off = pl.multiple_of(r * P, 128)
                col_off = pl.multiple_of(gj * P, 128)
                o_ref[:, pl.ds(row_off, P), pl.ds(col_off, P)] = x_ref[idx]
        else:
            for r in range(rows):
                for g0 in range(0, G, K):
                    if K == 1:
                        chunk = x_ref[r * G + g0]
                    else:
                        # Group K adjacent patches into one wide (C, P, K*P) store.
                        chunk = jnp.concatenate(
                            [x_ref[r * G + g0 + t] for t in range(K)], axis=-1)
                    o_ref[:, r * P:(r + 1) * P, g0 * P:(g0 + K) * P] = chunk

    return fold_kernel


def patch_positional_extractor(x, *, channels: int, patch_size: int, output_size: int):
    """Pallas implementation of PatchPositionalExtractor.forward."""
    assert output_size % patch_size == 0, "Output size must be divisible by patch size"
    B, seq, D = x.shape
    P = patch_size
    W = output_size
    G = output_size // P          # patches per side
    Np = G * G                    # number of tokens actually used
    assert D == channels * P * P, "token dim must equal C * P * P"
    assert seq >= Np, "sequence must contain at least (output_size/patch_size)^2 tokens"

    itemsize = jnp.dtype(x.dtype).itemsize
    assert itemsize in (1, 2, 4), "sub-byte dtypes are not supported by this wrapper"
    sublanes = {4: 8, 2: 16, 1: 32}[itemsize]

    # ---- HW-derived VMEM budget (v7x: 64 MiB/TC, v5e/v6e: 128 MiB). ----------
    try:
        vmem_cap = int(getattr(pltpu.get_tpu_info(), "vmem_capacity_bytes", 64 << 20))
    except Exception:
        vmem_cap = 64 << 20        # conservative v7x default
    budget = int(vmem_cap * 0.70)  # leave headroom for pipeline bookkeeping

    # One row-slab: G tokens in == one (C, P, W) output slab (identical byte count).
    row_bytes = G * channels * P * P * itemsize

    # Valid `rows` candidates: divisors of G whose output block second-minor dim
    # (rows*P) is sublane-aligned (or covers the full H dim when rows == G).
    candidates = [r for r in range(1, G + 1)
                  if G % r == 0 and (r == G or (r * P) % sublanes == 0)]
    rows = candidates[0]
    for r in sorted(candidates, reverse=True):
        # in block + out block, each double-buffered => 4 * row-slab bytes.
        if 4 * r * row_bytes + (1 << 20) <= budget:
            rows = r
            break

    vmem_needed = 4 * rows * row_bytes + (2 << 20)
    vmem_limit = int(min(max(vmem_needed, 32 << 20), int(vmem_cap * 0.9)))
    # If even the minimal slab overflows VMEM, a finer (channel/column) split
    # would be needed; out of scope for the configs this module targets.
    assert vmem_needed <= int(vmem_cap * 0.9), (
        "minimal row-slab does not fit VMEM; needs channel/column splitting")

    use_dynamic_loop = (P % 128 == 0) and (rows * G >= 16)

    # Free reshape (no data movement): split the token feature dim into (C, P, P).
    # The x[:, :Np, :] slice of the PyTorch module is realized purely through the
    # input index_map below (only the needed tokens are ever DMA'd).
    xs = x.reshape(B, seq, channels, P, P)

    kernel = _make_fold_kernel(rows=rows, G=G, P=P, use_dynamic_loop=use_dynamic_loop)

    out = pl.pallas_call(
        kernel,
        grid=(B, G // rows),   # batch leading; both axes independent -> parallel
        in_specs=[
            pl.BlockSpec(
                (None, rows * G, channels, P, P),
                # seq block index s with block size rows*G -> tokens
                # s*rows*G .. (s+1)*rows*G - 1 (the rows [s*rows, (s+1)*rows)).
                lambda b, s: (b, s, 0, 0, 0),
            )
        ],
        out_specs=pl.BlockSpec(
            (None, channels, rows * P, W),
            # output rows s*rows*P .. (s+1)*rows*P - 1, all columns.
            lambda b, s: (b, 0, s, 0),
        ),
        out_shape=jax.ShapeDtypeStruct((B, channels, output_size, output_size), x.dtype),
        compiler_params=pltpu.CompilerParams(
            dimension_semantics=("parallel", "parallel"),
            vmem_limit_bytes=vmem_limit,
        ),
        cost_estimate=pl.CostEstimate(
            flops=0,
            transcendentals=0,
            bytes_accessed=2 * B * Np * channels * P * P * itemsize,
        ),
    )(xs)
    return out


def _reference(x, *, channels, patch_size, output_size):
    # Pure-JAX reference of nn.Fold with stride == kernel_size (non-overlapping).
    B, _, _ = x.shape
    P = patch_size
    G = output_size // P
    Np = G * G
    xs = x[:, :Np, :].reshape(B, G, G, channels, P, P)
    return xs.transpose(0, 3, 1, 4, 2, 5).reshape(B, channels, output_size, output_size)


if __name__ == "__main__":
    key = jax.random.PRNGKey(0)

    # --- Test 1: small demo config (P < 128 -> grouped lane stores path). -----
    B, C, P, W = 2, 3, 16, 64
    G = W // P
    seq = G * G + 1                       # extra token; module slices x[:, :Np, :]
    x = jax.random.normal(key, (B, seq, C * P * P), dtype=jnp.float32)
    out = patch_positional_extractor(x, channels=C, patch_size=P, output_size=W)
    out = jax.block_until_ready(out)
    ref = _reference(x, channels=C, patch_size=P, output_size=W)
    assert out.shape == (B, C, W, W)
    assert bool(jnp.array_equal(out, ref)), "Pallas fold mismatch (small config)"

    # --- Test 2: module-default geometry (P=128 -> dynamic pl.loop path). -----
    B2, C2, P2, W2 = 1, 3, 128, 512
    G2 = W2 // P2
    seq2 = G2 * G2 + 1
    x2 = jax.random.normal(jax.random.PRNGKey(0), (B2, seq2, C2 * P2 * P2),
                           dtype=jnp.float32)
    out2 = patch_positional_extractor(x2, channels=C2, patch_size=P2, output_size=W2)
    out2 = jax.block_until_ready(out2)
    ref2 = _reference(x2, channels=C2, patch_size=P2, output_size=W2)
    assert out2.shape == (B2, C2, W2, W2)
    assert bool(jnp.array_equal(out2, ref2)), "Pallas fold mismatch (default config)"

    print("KERNEL_OK")
</pallas_src>

<mosaic_0001>
module attributes {stable_mosaic.version = 11 : i64} {
  func.func @fold_kernel(%arg0: i32, %arg1: i32, %arg2: memref<1x16x3x16x16xf32, #tpu.memory_space<vmem>>, %arg3: memref<1x3x64x64xf32, #tpu.memory_space<vmem>>) attributes {dimension_semantics = [#tpu.dimension_semantics<parallel>, #tpu.dimension_semantics<parallel>], iteration_bounds = array<i64: 2, 1>, scalar_prefetch = 0 : i64, scratch_operands = 0 : i64, tpu.core_type = #tpu.core_type<tc>, window_params = [{transform_indices = @transform_0, window_bounds = array<i64: 1, 16, 3, 16, 16>}, {transform_indices = @transform_1, window_bounds = array<i64: 1, 3, 64, 64>}]} {
    %c0 = arith.constant 0 : index
    %c0_0 = arith.constant 0 : index
    %c0_1 = arith.constant 0 : index
    %c0_2 = arith.constant 0 : index
    %c0_3 = arith.constant 0 : index
    %0 = vector.load %arg2[%c0, %c0_0, %c0_1, %c0_2, %c0_3] : memref<1x16x3x16x16xf32, #tpu.memory_space<vmem>>, vector<1x1x3x16x16xf32>
    %1 = vector.shape_cast %0 : vector<1x1x3x16x16xf32> to vector<3x16x16xf32>
    %c0_4 = arith.constant 0 : index
    %c1 = arith.constant 1 : index
    %c0_5 = arith.constant 0 : index
    %c0_6 = arith.constant 0 : index
    %c0_7 = arith.constant 0 : index
    %2 = vector.load %arg2[%c0_4, %c1, %c0_5, %c0_6, %c0_7] : memref<1x16x3x16x16xf32, #tpu.memory_space<vmem>>, vector<1x1x3x16x16xf32>
    %3 = vector.shape_cast %2 : vector<1x1x3x16x16xf32> to vector<3x16x16xf32>
    %c0_8 = arith.constant 0 : index
    %c2 = arith.constant 2 : index
    %c0_9 = arith.constant 0 : index
    %c0_10 = arith.constant 0 : index
    %c0_11 = arith.constant 0 : index
    %4 = vector.load %arg2[%c0_8, %c2, %c0_9, %c0_10, %c0_11] : memref<1x16x3x16x16xf32, #tpu.memory_space<vmem>>, vector<1x1x3x16x16xf32>
    %5 = vector.shape_cast %4 : vector<1x1x3x16x16xf32> to vector<3x16x16xf32>
    %c0_12 = arith.constant 0 : index
    %c3 = arith.constant 3 : index
    %c0_13 = arith.constant 0 : index
    %c0_14 = arith.constant 0 : index
    %c0_15 = arith.constant 0 : index
    %6 = vector.load %arg2[%c0_12, %c3, %c0_13, %c0_14, %c0_15] : memref<1x16x3x16x16xf32, #tpu.memory_space<vmem>>, vector<1x1x3x16x16xf32>
    %7 = vector.shape_cast %6 : vector<1x1x3x16x16xf32> to vector<3x16x16xf32>
    %8 = tpu.concatenate %1, %3, %5, %7 in 2 : vector<3x16x16xf32>, vector<3x16x16xf32>, vector<3x16x16xf32>, vector<3x16x16xf32> -> vector<3x16x64xf32>
    %c0_16 = arith.constant 0 : index
    %c0_17 = arith.constant 0 : index
    %c0_18 = arith.constant 0 : index
    %c0_19 = arith.constant 0 : index
    %9 = vector.load %arg3[%c0_16, %c0_17, %c0_18, %c0_19] : memref<1x3x64x64xf32, #tpu.memory_space<vmem>>, vector<1x3x16x64xf32>
    %10 = vector.shape_cast %9 : vector<1x3x16x64xf32> to vector<3x16x64xf32>
    %11 = vector.shape_cast %8 : vector<3x16x64xf32> to vector<1x3x16x64xf32>
    tpu.vector_store %arg3[%c0_16, %c0_17, %c0_18, %c0_19], %11 {strides = array<i32>} : memref<1x3x64x64xf32, #tpu.memory_space<vmem>>, vector<1x3x16x64xf32>,
    %c0_20 = arith.constant 0 : index
    %c4 = arith.constant 4 : index
    %c0_21 = arith.constant 0 : index
    %c0_22 = arith.constant 0 : index
    %c0_23 = arith.constant 0 : index
    %12 = vector.load %arg2[%c0_20, %c4, %c0_21, %c0_22, %c0_23] : memref<1x16x3x16x16xf32, #tpu.memory_space<vmem>>, vector<1x1x3x16x16xf32>
    %13 = vector.shape_cast %12 : vector<1x1x3x16x16xf32> to vector<3x16x16xf32>
    %c0_24 = arith.constant 0 : index
    %c5 = arith.constant 5 : index
    %c0_25 = arith.constant 0 : index
    %c0_26 = arith.constant 0 : index
    %c0_27 = arith.constant 0 : index
    %14 = vector.load %arg2[%c0_24, %c5, %c0_25, %c0_26, %c0_27] : memref<1x16x3x16x16xf32, #tpu.memory_space<vmem>>, vector<1x1x3x16x16xf32>
    %15 = vector.shape_cast %14 : vector<1x1x3x16x16xf32> to vector<3x16x16xf32>
    %c0_28 = arith.constant 0 : index
    %c6 = arith.constant 6 : index
    %c0_29 = arith.constant 0 : index
    %c0_30 = arith.constant 0 : index
    %c0_31 = arith.constant 0 : index
    %16 = vector.load %arg2[%c0_28, %c6, %c0_29, %c0_30, %c0_31] : memref<1x16x3x16x16xf32, #tpu.memory_space<vmem>>, vector<1x1x3x16x16xf32>
    %17 = vector.shape_cast %16 : vector<1x1x3x16x16xf32> to vector<3x16x16xf32>
    %c0_32 = arith.constant 0 : index
    %c7 = arith.constant 7 : index
    %c0_33 = arith.constant 0 : index
    %c0_34 = arith.constant 0 : index
    %c0_35 = arith.constant 0 : index
    %18 = vector.load %arg2[%c0_32, %c7, %c0_33, %c0_34, %c0_35] : memref<1x16x3x16x16xf32, #tpu.memory_space<vmem>>, vector<1x1x3x16x16xf32>
    %19 = vector.shape_cast %18 : vector<1x1x3x16x16xf32> to vector<3x16x16xf32>
    %20 = tpu.concatenate %13, %15, %17, %19 in 2 : vector<3x16x16xf32>, vector<3x16x16xf32>, vector<3x16x16xf32>, vector<3x16x16xf32> -> vector<3x16x64xf32>
    %c0_36 = arith.constant 0 : index
    %c0_37 = arith.constant 0 : index
    %c16 = arith.constant 16 : index
    %c0_38 = arith.constant 0 : index
    %21 = vector.load %arg3[%c0_36, %c0_37, %c16, %c0_38] : memref<1x3x64x64xf32, #tpu.memory_space<vmem>>, vector<1x3x16x64xf32>
    %22 = vector.shape_cast %21 : vector<1x3x16x64xf32> to vector<3x16x64xf32>
    %23 = vector.shape_cast %20 : vector<3x16x64xf32> to vector<1x3x16x64xf32>
    tpu.vector_store %arg3[%c0_36, %c0_37, %c16, %c0_38], %23 {strides = array<i32>} : memref<1x3x64x64xf32, #tpu.memory_space<vmem>>, vector<1x3x16x64xf32>,
    %c0_39 = arith.constant 0 : index
    %c8 = arith.constant 8 : index
    %c0_40 = arith.constant 0 : index
    %c0_41 = arith.constant 0 : index
    %c0_42 = arith.constant 0 : index
    %24 = vector.load %arg2[%c0_39, %c8, %c0_40, %c0_41, %c0_42] : memref<1x16x3x16x16xf32, #tpu.memory_space<vmem>>, vector<1x1x3x16x16xf32>
    %25 = vector.shape_cast %24 : vector<1x1x3x16x16xf32> to vector<3x16x16xf32>
    %c0_43 = arith.constant 0 : index
    %c9 = arith.constant 9 : index
    %c0_44 = arith.constant 0 : index
    %c0_45 = arith.constant 0 : index
    %c0_46 = arith.constant 0 : index
    %26 = vector.load %arg2[%c0_43, %c9, %c0_44, %c0_45, %c0_46] : memref<1x16x3x16x16xf32, #tpu.memory_space<vmem>>, vector<1x1x3x16x16xf32>
    %27 = vector.shape_cast %26 : vector<1x1x3x16x16xf32> to vector<3x16x16xf32>
    %c0_47 = arith.constant 0 : index
    %c10 = arith.constant 10 : index
    %c0_48 = arith.constant 0 : index
    %c0_49 = arith.constant 0 : index
    %c0_50 = arith.constant 0 : index
    %28 = vector.load %arg2[%c0_47, %c10, %c0_48, %c0_49, %c0_50] : memref<1x16x3x16x16xf32, #tpu.memory_space<vmem>>, vector<1x1x3x16x16xf32>
    %29 = vector.shape_cast %28 : vector<1x1x3x16x16xf32> to vector<3x16x16xf32>
    %c0_51 = arith.constant 0 : index
    %c11 = arith.constant 11 : index
    %c0_52 = arith.constant 0 : index
    %c0_53 = arith.constant 0 : index
    %c0_54 = arith.constant 0 : index
    %30 = vector.load %arg2[%c0_51, %c11, %c0_52, %c0_53, %c0_54] : memref<1x16x3x16x16xf32, #tpu.memory_space<vmem>>, vector<1x1x3x16x16xf32>
    %31 = vector.shape_cast %30 : vector<1x1x3x16x16xf32> to vector<3x16x16xf32>
    %32 = tpu.concatenate %25, %27, %29, %31 in 2 : vector<3x16x16xf32>, vector<3x16x16xf32>, vector<3x16x16xf32>, vector<3x16x16xf32> -> vector<3x16x64xf32>
    %c0_55 = arith.constant 0 : index
    %c0_56 = arith.constant 0 : index
    %c32 = arith.constant 32 : index
    %c0_57 = arith.constant 0 : index
    %33 = vector.load %arg3[%c0_55, %c0_56, %c32, %c0_57] : memref<1x3x64x64xf32, #tpu.memory_space<vmem>>, vector<1x3x16x64xf32>
    %34 = vector.shape_cast %33 : vector<1x3x16x64xf32> to vector<3x16x64xf32>
    %35 = vector.shape_cast %32 : vector<3x16x64xf32> to vector<1x3x16x64xf32>
    tpu.vector_store %arg3[%c0_55, %c0_56, %c32, %c0_57], %35 {strides = array<i32>} : memref<1x3x64x64xf32, #tpu.memory_space<vmem>>, vector<1x3x16x64xf32>,
    %c0_58 = arith.constant 0 : index
    %c12 = arith.constant 12 : index
    %c0_59 = arith.constant 0 : index
    %c0_60 = arith.constant 0 : index
    %c0_61 = arith.constant 0 : index
    %36 = vector.load %arg2[%c0_58, %c12, %c0_59, %c0_60, %c0_61] : memref<1x16x3x16x16xf32, #tpu.memory_space<vmem>>, vector<1x1x3x16x16xf32>
    %37 = vector.shape_cast %36 : vector<1x1x3x16x16xf32> to vector<3x16x16xf32>
    %c0_62 = arith.constant 0 : index
    %c13 = arith.constant 13 : index
    %c0_63 = arith.constant 0 : index
    %c0_64 = arith.constant 0 : index
    %c0_65 = arith.constant 0 : index
    %38 = vector.load %arg2[%c0_62, %c13, %c0_63, %c0_64, %c0_65] : memref<1x16x3x16x16xf32, #tpu.memory_space<vmem>>, vector<1x1x3x16x16xf32>
    %39 = vector.shape_cast %38 : vector<1x1x3x16x16xf32> to vector<3x16x16xf32>
    %c0_66 = arith.constant 0 : index
    %c14 = arith.constant 14 : index
    %c0_67 = arith.constant 0 : index
    %c0_68 = arith.constant 0 : index
    %c0_69 = arith.constant 0 : index
    %40 = vector.load %arg2[%c0_66, %c14, %c0_67, %c0_68, %c0_69] : memref<1x16x3x16x16xf32, #tpu.memory_space<vmem>>, vector<1x1x3x16x16xf32>
    %41 = vector.shape_cast %40 : vector<1x1x3x16x16xf32> to vector<3x16x16xf32>
    %c0_70 = arith.constant 0 : index
    %c15 = arith.constant 15 : index
    %c0_71 = arith.constant 0 : index
    %c0_72 = arith.constant 0 : index
    %c0_73 = arith.constant 0 : index
    %42 = vector.load %arg2[%c0_70, %c15, %c0_71, %c0_72, %c0_73] : memref<1x16x3x16x16xf32, #tpu.memory_space<vmem>>, vector<1x1x3x16x16xf32>
    %43 = vector.shape_cast %42 : vector<1x1x3x16x16xf32> to vector<3x16x16xf32>
    %44 = tpu.concatenate %37, %39, %41, %43 in 2 : vector<3x16x16xf32>, vector<3x16x16xf32>, vector<3x16x16xf32>, vector<3x16x16xf32> -> vector<3x16x64xf32>
    %c0_74 = arith.constant 0 : index
    %c0_75 = arith.constant 0 : index
    %c48 = arith.constant 48 : index
    %c0_76 = arith.constant 0 : index
    %45 = vector.load %arg3[%c0_74, %c0_75, %c48, %c0_76] : memref<1x3x64x64xf32, #tpu.memory_space<vmem>>, vector<1x3x16x64xf32>
    %46 = vector.shape_cast %45 : vector<1x3x16x64xf32> to vector<3x16x64xf32>
    %47 = vector.shape_cast %44 : vector<3x16x64xf32> to vector<1x3x16x64xf32>
    tpu.vector_store %arg3[%c0_74, %c0_75, %c48, %c0_76], %47 {strides = array<i32>} : memref<1x3x64x64xf32, #tpu.memory_space<vmem>>, vector<1x3x16x64xf32>,
    return
  }
  func.func @transform_0(%arg0: i32, %arg1: i32) -> (i32, i32, i32, i32, i32) {
    %c0_i32 = arith.constant 0 : i32
    %c0_i32_0 = arith.constant 0 : i32
    %c0_i32_1 = arith.constant 0 : i32
    %c0_i32_2 = arith.constant 0 : i32
    return %arg0, %arg1, %c0_i32, %c0_i32_0, %c0_i32_1 : i32, i32, i32, i32, i32
  }
  func.func @transform_1(%arg0: i32, %arg1: i32) -> (i32, i32, i32, i32) {
    %c0_i32 = arith.constant 0 : i32
    %c0_i32_0 = arith.constant 0 : i32
    %c0_i32_1 = arith.constant 0 : i32
    return %arg0, %c0_i32, %arg1, %c0_i32_0 : i32, i32, i32, i32
  }
}

</mosaic_0001>

<bundles_post_ra>
// kernel: tpu_custom_call.1
= control target key start
LH: loop header
LB: loop body
LE: loop exit
PB: predicated region body
PF: predicated region fallthrough
CT: control target
= control target key end

     0   :  { %6 = vsyncpa [#allocation3], 0  ;;  %s1464_s0 = inlined_call_operand.vmem [shape: f32[2,17,3,16,16], index: 0, kind: input, shape index: {}]   ;;  %s1465_s1 = inlined_call_operand.hbm [shape: f32[2,3,64,64], index: 1, kind: output, shape index: {}]  }
   0x1   :  { %8 = vsyncpa [#allocation3 + $0x1], 0  ;;  %s1034_s6 = smov 0   ;;  %s1036_s7 = smov 0  }
   0x2   :  { %s1038_s8 = smov 0   ;;  %s1040_s9 = smov 0  }
   0x3   :  { %s1042_s10 = smov 0   ;;  %s1044_s11 = smov 0  }
   0x4 LB: > { %s776_s12 = sadd.s32 4294967295, %s1016_s11   ;;  %s777_s13 = sadd.s32 4294967294, %s1016_s11   ;;  %s1016_s11 = sphi %s1044_s11, %s14_s11   ;;  %s1012_s10 = sphi %s1042_s10, %s1472_s10   ;;  %s1008_s9 = sphi %s1040_s9, %s1471_s9   ;;  %s1004_s8 = sphi %s1038_s8, %s1470_s8   ;;  %s1000_s7 = sphi %s1036_s7, %s1469_s7   ;;  %s996_s6 = sphi %s1034_s6, %s1468_s6  }
   0x5   : > { %s26_s14 = sadd.s32 1, %s1012_s10  ;;  %s63_s15 = sadd.s32 1, %s1004_s8 }
   0x6   : > { %p28_p0 = scmp.ge.s32.totalorder %s26_s14, 2  ;;  %p73_p1 = scmp.ne.s32.totalorder %s1004_s8, %s1000_s7 }
   0x7   : > { %p74_p2 = scmp.eq.s32.totalorder %s776_s12, 1  ;;  %p79_p3 = scmp.ne.s32.totalorder %s1000_s7, %s996_s6 }
   0x8   : > { %s1474_s14 = smov (%p28_p0, %s26_s14), 0  ;;  %p80_p5 = scmp.eq.s32.totalorder %s777_s13, 1 }
   0x9   : > { %p1074_p4 = por %p74_p2, %p73_p1  ;;  %s58_s17 = ssub.s32 %s1012_s10, %s1474_s14 }
   0xa   : > { %p780_p6 = scmp.ge.s32.totalorder %s1016_s11, 1  ;;  %p61_p7 = scmp.eq.s32.totalorder %s58_s17, 0 }
   0xb   : > { %p1081_p8 = por %p80_p5, %p79_p3  ;;  %p124_p9 = scmp.lt.s32.totalorder %s1016_s11, 3 }
   0xc   : > { %s1087_s19 = scalar_select %p61_p7, %s1004_s8, %s63_s15  }
   0xd   : > { %p125_p10 = pnand %p780_p6, %p124_p9 }
   0xe   : > { %p162_p11 = scmp.lt.s32.totalorder (!%p125_p10), %s1008_s9, 1  ;;  %s1018_s25 = smov (!%p125_p10), 16   ;;  %vm278_vm0 = vcmask (!%p125_p10), 130048   ;;  %vm285_vm1 = vcmask (!%p125_p10), 261120   ;;  %vm292_vm2 = vcmask (!%p125_p10), 392192   ;;  %vm299_vm3 = vcmask (!%p125_p10), 523264  }
   0xf   : > { %128 = sbr.rel (%p125_p10) target bundleno = 299 (0x12b), region = 24  ;;  %s1019_s26 = smov (!%p125_p10), 32  }
  0x10   : > { %s1020_s27 = smov (!%p125_p10), 48   ;;  %s152_s28 = sand.u32 (!%p125_p10), 1, %s1000_s7  }
  0x11   : > { %s875_s29 = smul.u32 (!%p125_p10), 192, %s152_s28  ;;  %s1418_s12 = scalar_lea.sflag (!%p125_p10), [#allocation3], %s152_s28 }
  0x12   : > { %s877_s2 = smul.u32 (!%p125_p10), 3072, %s1008_s9  ;;  %s1021_s15 = smov (!%p125_p10), [#allocation2]  }
  0x13   : > { %s1251_s30 = scalar_lea.vmem (!%p125_p10), [#allocation2], %s875_s29  ;;  %s942_s17 = sshll.u32 (!%p125_p10), %s1021_s15, 4  ;;  %s943_s17 = int_to_ptr.vmem [resolvable:$false] %s942_s17 }
  0x14   : > { %s694_s3 = sshll.u32 (!%p125_p10), %s1251_s30, 4  ;;  %s1404_s3 = int_to_ptr.vmem [resolvable:$true] %s694_s3 }
  0x15   : > { %s938_s13 = scalar_lea.vmem (!%p125_p10), %s1404_s3, 3072  ;;  %p945_p1 = scmp.lt.s32.totalorder (!%p125_p10), %s1404_s3, %s943_s17 }
  0x16   : > { %s163_s20 = scalar_select %p162_p11, %s1008_s9, 1 }
  0x17   : > { %s1402_s9 = scalar_lea.hbm %s1465_s1, %s877_s2  ;;  %p939_p12 = scmp.ne.s32.totalorder %s1404_s3, %s938_s13 }
  0x18   : > { %s876_s21 = smul.u32 816, %s163_s20  ;;  %s944_s20 = scalar_lea.vmem %s943_s17, 6144 }
  0x19   : > { %p940_p13 = pnand %p939_p12, %p1074_p4  ;;  %p946_p2 = scmp.lt.s32.totalorder %s944_s20, %s938_s13 }
  0x1a   : > { %s1094_s24 = scalar_lea.vmem %s1464_s0, %s876_s21 }
  0x1b   : > { %v784_v0 = vld [vmem:[%s1094_s24 + $0x40] sm:$0xff]  ;;  %v782_v1 = vld [vmem:[%s1094_s24 + $0x30] sm:$0xff]  ;;  %v785_v2 = vld [vmem:[%s1094_s24 + $0x48] sm:$0xff]  ;;  %p941_p0 = pneg %p940_p13  ;;  %p947_p3 = por %p946_p2, %p945_p1 }
  0x1c   : > { %216 = vrot.lane.b32.xlu1 %v784_v0, %s1018_s25  ;;  %212 = vrot.lane.b32.xlu0 %v782_v1, %s1018_s25  ;;  %v783_v3 = vld [vmem:[%s1094_s24 + $0x38] sm:$0xff]  ;;  %v786_v5 = vld [vmem:[%s1094_s24 + $0x50] sm:$0xff] }
  0x1d   : > { %v787_v4 = vld [vmem:[%s1094_s24 + $0x58] sm:$0xff]  ;;  %v789_v6 = vld [vmem:[%s1094_s24 + $0x68] sm:$0xff]  ;;  %v788_v7 = vld [vmem:[%s1094_s24 + $0x60] sm:$0xff]  ;;  %p948_p5 = pnand %p947_p3, %p941_p0 }
  0x1e   : > { %v791_v8 = vld [vmem:[%s1094_s24 + $0x78] sm:$0xff]  ;;  %v790_v9 = vld [vmem:[%s1094_s24 + $0x70] sm:$0xff]  ;;  %v793_v10 = vld [vmem:[%s1094_s24 + $0x88] sm:$0xff] }
  0x1f   : > { %v792_v11 = vld [vmem:[%s1094_s24 + $0x80] sm:$0xff]  ;;  %v795_v12 = vld [vmem:[%s1094_s24 + $0x98] sm:$0xff]  ;;  %v794_v13 = vld [vmem:[%s1094_s24 + $0x90] sm:$0xff] }
  0x20   : > { %218 = vrot.lane.b32.xlu1 %v785_v2, %s1018_s25  ;;  %214 = vrot.lane.b32.xlu0 %v783_v3, %s1018_s25  ;;  %v797_v14 = vld [vmem:[%s1094_s24 + $0xa8] sm:$0xff]  ;;  %v796_v15 = vld [vmem:[%s1094_s24 + $0xa0] sm:$0xff] }
  0x21   : > { %v799_v16 = vld [vmem:[%s1094_s24 + $0xb8] sm:$0xff]  ;;  %v798_v17 = vld [vmem:[%s1094_s24 + $0xb0] sm:$0xff]  ;;  %v809_v20 = vld [vmem:[%s1094_s24 + $0x108] sm:$0xff] }
  0x22   : > { %v807_v18 = vld [vmem:[%s1094_s24 + $0xf8] sm:$0xff]  ;;  %v806_v19 = vld [vmem:[%s1094_s24 + $0xf0] sm:$0xff]  ;;  %v808_v21 = vld [vmem:[%s1094_s24 + $0x100] sm:$0xff] }
  0x23   : > { %v811_v22 = vld [vmem:[%s1094_s24 + $0x118] sm:$0xff]  ;;  %v810_v23 = vld [vmem:[%s1094_s24 + $0x110] sm:$0xff]  ;;  %v813_v24 = vld [vmem:[%s1094_s24 + $0x128] sm:$0xff] }
  0x24   : > { %222 = vrot.lane.b32.xlu1 %v787_v4, %s1018_s25  ;;  %220 = vrot.lane.b32.xlu0 %v786_v5, %s1018_s25  ;;  %v812_v25 = vld [vmem:[%s1094_s24 + $0x120] sm:$0xff]  ;;  %v815_v26 = vld [vmem:[%s1094_s24 + $0x138] sm:$0xff] }
  0x25   : > { %v814_v27 = vld [vmem:[%s1094_s24 + $0x130] sm:$0xff]  ;;  %v817_v28 = vld [vmem:[%s1094_s24 + $0x148] sm:$0xff]  ;;  %v816_v29 = vld [vmem:[%s1094_s24 + $0x140] sm:$0xff] }
  0x26   : > { %v819_v30 = vld [vmem:[%s1094_s24 + $0x158] sm:$0xff]  ;;  %v818_v31 = vld [vmem:[%s1094_s24 + $0x150] sm:$0xff]  ;;  %v821_v32 = vld [vmem:[%s1094_s24 + $0x168] sm:$0xff] }
  0x27   : > { %v820_v33 = vld [vmem:[%s1094_s24 + $0x160] sm:$0xff]  ;;  %v823_v34 = vld [vmem:[%s1094_s24 + $0x178] sm:$0xff]  ;;  %v822_v35 = vld [vmem:[%s1094_s24 + $0x170] sm:$0xff] }
  0x28   : > { %238 = vrot.lane.b32.xlu1 %v789_v6, %s1019_s26  ;;  %236 = vrot.lane.b32.xlu0 %v788_v7, %s1019_s26  ;;  %v831_v36 = vld [vmem:[%s1094_s24 + $0x1b8] sm:$0xff]  ;;  %v830_v37 = vld [vmem:[%s1094_s24 + $0x1b0] sm:$0xff] }
  0x29   : > { %v833_v38 = vld [vmem:[%s1094_s24 + $0x1c8] sm:$0xff]  ;;  %v832_v39 = vld [vmem:[%s1094_s24 + $0x1c0] sm:$0xff]  ;;  %v835_v40 = vld [vmem:[%s1094_s24 + $0x1d8] sm:$0xff] }
  0x2a   : > { %v834_v41 = vld [vmem:[%s1094_s24 + $0x1d0] sm:$0xff]  ;;  %v855_v42 = vld [vmem:[%s1094_s24 + $0x278] sm:$0xff]  ;;  %v857_v44 = vld [vmem:[%s1094_s24 + $0x288] sm:$0xff] }
  0x2b   : > { %v854_v43 = vld [vmem:[%s1094_s24 + $0x270] sm:$0xff]  ;;  %v856_v45 = vld [vmem:[%s1094_s24 + $0x280] sm:$0xff]  ;;  %v859_v46 = vld [vmem:[%s1094_s24 + $0x298] sm:$0xff] }
  0x2c   : > { %242 = vrot.lane.b32.xlu1 %v791_v8, %s1019_s26  ;;  %240 = vrot.lane.b32.xlu0 %v790_v9, %s1019_s26  ;;  %v858_v47 = vld [vmem:[%s1094_s24 + $0x290] sm:$0xff]  ;;  %v837_v48 = vld [vmem:[%s1094_s24 + $0x1e8] sm:$0xff] }
  0x2d   : > { %v836_v49 = vld [vmem:[%s1094_s24 + $0x1e0] sm:$0xff]  ;;  %v839_v50 = vld [vmem:[%s1094_s24 + $0x1f8] sm:$0xff]  ;;  %v838_v51 = vld [vmem:[%s1094_s24 + $0x1f0] sm:$0xff] }
  0x2e   : > { %v841_v52 = vld [vmem:[%s1094_s24 + $0x208] sm:$0xff]  ;;  %v840_v53 = vld [vmem:[%s1094_s24 + $0x200] sm:$0xff]  ;;  %v863_v56 = vld [vmem:[%s1094_s24 + $0x2b8] sm:$0xff] }
  0x2f   : > { %v861_v54 = vld [vmem:[%s1094_s24 + $0x2a8] sm:$0xff]  ;;  %v860_v55 = vld [vmem:[%s1094_s24 + $0x2a0] sm:$0xff]  ;;  %v862_v57 = vld [vmem:[%s1094_s24 + $0x2b0] sm:$0xff] }
  0x30   : > { %246 = vrot.lane.b32.xlu1 %v793_v10, %s1019_s26  ;;  %244 = vrot.lane.b32.xlu0 %v792_v11, %s1019_s26  ;;  %v865_v58 = vld [vmem:[%s1094_s24 + $0x2c8] sm:$0xff]  ;;  %v864_v59 = vld [vmem:[%s1094_s24 + $0x2c0] sm:$0xff] }
  0x31   : > { %v843_v62 = vld [vmem:[%s1094_s24 + $0x218] sm:$0xff]  ;;  %v842_v63 = vld [vmem:[%s1094_s24 + $0x210] sm:$0xff]  ;;  %v845_v2 = vld [vmem:[%s1094_s24 + $0x228] sm:$0xff] }
  0x32   : > { %v844_v3 = vld [vmem:[%s1094_s24 + $0x220] sm:$0xff]  ;;  %v847_v6 = vld [vmem:[%s1094_s24 + $0x238] sm:$0xff]  ;;  %v846_v7 = vld [vmem:[%s1094_s24 + $0x230] sm:$0xff] }
  0x33   : > { %v867_v10 = vld [vmem:[%s1094_s24 + $0x2d8] sm:$0xff]  ;;  %v866_v11 = vld [vmem:[%s1094_s24 + $0x2d0] sm:$0xff] }
  0x34   : > { %262 = vrot.lane.b32.xlu1 %v795_v12, %s1020_s27  ;;  %260 = vrot.lane.b32.xlu0 %v794_v13, %s1020_s27 }
  0x38   : > { %266 = vrot.lane.b32.xlu1 %v797_v14, %s1020_s27  ;;  %264 = vrot.lane.b32.xlu0 %v796_v15, %s1020_s27  ;;  %v869_v14 = vld [vmem:[%s1094_s24 + $0x2e8] sm:$0xff]  ;;  %v868_v15 = vld [vmem:[%s1094_s24 + $0x2e0] sm:$0xff] }
  0x3c   : > { %270 = vrot.lane.b32.xlu1 %v799_v16, %s1020_s27  ;;  %268 = vrot.lane.b32.xlu0 %v798_v17, %s1020_s27  ;;  %v179_v16 = vld [vmem:[%s1094_s24] sm:$0xff]  ;;  %v180_v17 = vld [vmem:[%s1094_s24 + $0x8] sm:$0xff] }
  0x40   : > { %342 = vrot.lane.b32.xlu1 %v807_v18, %s1018_s25  ;;  %340 = vrot.lane.b32.xlu0 %v806_v19, %s1018_s25 }
  0x44   : > { %346 = vrot.lane.b32.xlu1 %v809_v20, %s1018_s25  ;;  %344 = vrot.lane.b32.xlu0 %v808_v21, %s1018_s25 }
  0x48   : > { %350 = vrot.lane.b32.xlu1 %v811_v22, %s1018_s25  ;;  %348 = vrot.lane.b32.xlu0 %v810_v23, %s1018_s25  ;;  %v871_v22 = vld [vmem:[%s1094_s24 + $0x2f8] sm:$0xff]  ;;  %v870_v23 = vld [vmem:[%s1094_s24 + $0x2f0] sm:$0xff] }
  0x4c   : > { %366 = vrot.lane.b32.xlu1 %v813_v24, %s1019_s26  ;;  %364 = vrot.lane.b32.xlu0 %v812_v25, %s1019_s26  ;;  %v181_v24 = vld [vmem:[%s1094_s24 + $0x10] sm:$0xff]  ;;  %v182_v25 = vld [vmem:[%s1094_s24 + $0x18] sm:$0xff] }
  0x50   : > { %370 = vrot.lane.b32.xlu1 %v815_v26, %s1019_s26  ;;  %368 = vrot.lane.b32.xlu0 %v814_v27, %s1019_s26 }
  0x54   : > { %374 = vrot.lane.b32.xlu1 %v817_v28, %s1019_s26  ;;  %372 = vrot.lane.b32.xlu0 %v816_v29, %s1019_s26 }
  0x58   : > { %390 = vrot.lane.b32.xlu1 %v819_v30, %s1020_s27  ;;  %388 = vrot.lane.b32.xlu0 %v818_v31, %s1020_s27 }
  0x5c   : > { %394 = vrot.lane.b32.xlu1 %v821_v32, %s1020_s27  ;;  %392 = vrot.lane.b32.xlu0 %v820_v33, %s1020_s27 }
  0x60   : > { %398 = vrot.lane.b32.xlu1 %v823_v34, %s1020_s27  ;;  %396 = vrot.lane.b32.xlu0 %v822_v35, %s1020_s27  ;;  %v184_v34 = vld [vmem:[%s1094_s24 + $0x28] sm:$0xff]  ;;  %v183_v35 = vld [vmem:[%s1094_s24 + $0x20] sm:$0xff] }
  0x64   : > { %466 = vrot.lane.b32.xlu1 %v831_v36, %s1018_s25  ;;  %464 = vrot.lane.b32.xlu0 %v830_v37, %s1018_s25 }
  0x68   : > { %470 = vrot.lane.b32.xlu1 %v833_v38, %s1018_s25  ;;  %468 = vrot.lane.b32.xlu0 %v832_v39, %s1018_s25 }
  0x6c   : > { %474 = vrot.lane.b32.xlu1 %v835_v40, %s1018_s25  ;;  %472 = vrot.lane.b32.xlu0 %v834_v41, %s1018_s25 }
  0x70   : > { %590 = vrot.lane.b32.xlu1 %v855_v42, %s1018_s25  ;;  %588 = vrot.lane.b32.xlu0 %v854_v43, %s1018_s25 }
  0x74   : > { %594 = vrot.lane.b32.xlu1 %v857_v44, %s1018_s25  ;;  %592 = vrot.lane.b32.xlu0 %v856_v45, %s1018_s25 }
  0x78   : > { %598 = vrot.lane.b32.xlu1 %v859_v46, %s1018_s25  ;;  %596 = vrot.lane.b32.xlu0 %v858_v47, %s1018_s25 }
  0x7c   : > { %490 = vrot.lane.b32.xlu1 %v837_v48, %s1019_s26  ;;  %488 = vrot.lane.b32.xlu0 %v836_v49, %s1019_s26 }
  0x80   : > { %494 = vrot.lane.b32.xlu1 %v839_v50, %s1019_s26  ;;  %492 = vrot.lane.b32.xlu0 %v838_v51, %s1019_s26 }
  0x84   : > { %498 = vrot.lane.b32.xlu1 %v841_v52, %s1019_s26  ;;  %496 = vrot.lane.b32.xlu0 %v840_v53, %s1019_s26 }
  0x88   : > { %614 = vrot.lane.b32.xlu1 %v861_v54, %s1019_s26  ;;  %612 = vrot.lane.b32.xlu0 %v860_v55, %s1019_s26 }
  0x8c   : > { %618 = vrot.lane.b32.xlu1 %v863_v56, %s1019_s26  ;;  %616 = vrot.lane.b32.xlu0 %v862_v57, %s1019_s26 }
  0x8e   : > { %v217_v60 = vpop.permute.xlu1 %216  ;;  %v213_v61 = vpop.permute.xlu0 %212 }
  0x8f   : > { %v279_v20 = vsel %vm278_vm0, %v179_v16, %v213_v61  ;;  %v281_v32 = vsel %vm278_vm0, %v181_v24, %v217_v60  ;;  %v801_v60 = vld [vmem:[%s1094_s24 + $0xc8] sm:$0xff]  ;;  %v800_v61 = vld [vmem:[%s1094_s24 + $0xc0] sm:$0xff] }
  0x90   : > { %622 = vrot.lane.b32.xlu1 %v865_v58, %s1019_s26  ;;  %620 = vrot.lane.b32.xlu0 %v864_v59, %s1019_s26 }
  0x92   : > { %v219_v0 = vpop.permute.xlu1 %218  ;;  %v215_v1 = vpop.permute.xlu0 %214 }
  0x93   : > { %v280_v21 = vsel %vm278_vm0, %v180_v17, %v215_v1  ;;  %v282_v33 = vsel %vm278_vm0, %v182_v25, %v219_v0 }
  0x94   : > { %514 = vrot.lane.b32.xlu1 %v843_v62, %s1020_s27  ;;  %512 = vrot.lane.b32.xlu0 %v842_v63, %s1020_s27 }
  0x96   : > { %v223_v4 = vpop.permute.xlu1 %222  ;;  %v221_v5 = vpop.permute.xlu0 %220 }
  0x97   : > { %v284_v42 = vsel %vm278_vm0, %v184_v34, %v223_v4  ;;  %v283_v43 = vsel %vm278_vm0, %v183_v35, %v221_v5 }
  0x98   : > { %518 = vrot.lane.b32.xlu1 %v845_v2, %s1020_s27  ;;  %516 = vrot.lane.b32.xlu0 %v844_v3, %s1020_s27  ;;  %v803_v2 = vld [vmem:[%s1094_s24 + $0xd8] sm:$0xff]  ;;  %v802_v3 = vld [vmem:[%s1094_s24 + $0xd0] sm:$0xff] }
  0x9a   : > { %v239_v8 = vpop.permute.xlu1 %238  ;;  %v237_v9 = vpop.permute.xlu0 %236 }
  0x9b   : > { %v287_v26 = vsel %vm285_vm1, %v280_v21, %v239_v8  ;;  %v286_v27 = vsel %vm285_vm1, %v279_v20, %v237_v9 }
  0x9c   : > { %522 = vrot.lane.b32.xlu1 %v847_v6, %s1020_s27  ;;  %520 = vrot.lane.b32.xlu0 %v846_v7, %s1020_s27 }
  0x9e   : > { %v243_v12 = vpop.permute.xlu1 %242  ;;  %v241_v13 = vpop.permute.xlu0 %240 }
  0x9f   : > { %v289_v36 = vsel %vm285_vm1, %v282_v33, %v243_v12  ;;  %v288_v37 = vsel %vm285_vm1, %v281_v32, %v241_v13  ;;  %v805_v12 = vld [vmem:[%s1094_s24 + $0xe8] sm:$0xff]  ;;  %v804_v13 = vld [vmem:[%s1094_s24 + $0xe0] sm:$0xff] }
  0xa0   : > { %638 = vrot.lane.b32.xlu1 %v867_v10, %s1020_s27  ;;  %636 = vrot.lane.b32.xlu0 %v866_v11, %s1020_s27 }
  0xa2   : > { %v247_v18 = vpop.permute.xlu1 %246  ;;  %v245_v19 = vpop.permute.xlu0 %244 }
  0xa3   : > { %v291_v44 = vsel %vm285_vm1, %v284_v42, %v247_v18  ;;  %v290_v45 = vsel %vm285_vm1, %v283_v43, %v245_v19 }
  0xa4   : > { %642 = vrot.lane.b32.xlu1 %v869_v14, %s1020_s27  ;;  %640 = vrot.lane.b32.xlu0 %v868_v15, %s1020_s27 }
  0xa6   : > { %v263_v28 = vpop.permute.xlu1 %262  ;;  %v261_v29 = vpop.permute.xlu0 %260 }
  0xa7   : > { %v294_v30 = vsel %vm292_vm2, %v287_v26, %v263_v28  ;;  %v293_v31 = vsel %vm292_vm2, %v286_v27, %v261_v29 }
  0xa8   : > { %301 = vst.msk [vmem:[%s1251_s30 + $0x8] sm:$0xff] %vm299_vm3, %v294_v30  ;;  %300 = vst.msk [vmem:[%s1251_s30] sm:$0xff] %vm299_vm3, %v293_v31  ;;  %646 = vrot.lane.b32.xlu1 %v871_v22, %s1020_s27  ;;  %644 = vrot.lane.b32.xlu0 %v870_v23, %s1020_s27 }
  0xaa   : > { %v267_v38 = vpop.permute.xlu1 %266  ;;  %v265_v39 = vpop.permute.xlu0 %264 }
  0xab   : > { %v296_v40 = vsel %vm292_vm2, %v289_v36, %v267_v38  ;;  %v295_v41 = vsel %vm292_vm2, %v288_v37, %v265_v39 }
  0xac   : > { %303 = vst.msk [vmem:[%s1251_s30 + $0x48] sm:$0xff] %vm299_vm3, %v296_v40  ;;  %302 = vst.msk [vmem:[%s1251_s30 + $0x40] sm:$0xff] %vm299_vm3, %v295_v41 }
  0xae   : > { %v271_v46 = vpop.permute.xlu1 %270  ;;  %v269_v47 = vpop.permute.xlu0 %268 }
  0xaf   : > { %v298_v48 = vsel %vm292_vm2, %v291_v44, %v271_v46  ;;  %v297_v49 = vsel %vm292_vm2, %v290_v45, %v269_v47 }
  0xb0   : > { %305 = vst.msk [vmem:[%s1251_s30 + $0x88] sm:$0xff] %vm299_vm3, %v298_v48  ;;  %304 = vst.msk [vmem:[%s1251_s30 + $0x80] sm:$0xff] %vm299_vm3, %v297_v49 }
  0xb2   : > { %v343_v50 = vpop.permute.xlu1 %342  ;;  %v341_v51 = vpop.permute.xlu0 %340 }
  0xb3   : > { %v407_v0 = vsel %vm278_vm0, %v801_v60, %v343_v50  ;;  %v406_v1 = vsel %vm278_vm0, %v800_v61, %v341_v51  ;;  %v825_v50 = vld [vmem:[%s1094_s24 + $0x188] sm:$0xff]  ;;  %v824_v51 = vld [vmem:[%s1094_s24 + $0x180] sm:$0xff] }
  0xb6   : > { %v347_v52 = vpop.permute.xlu1 %346  ;;  %v345_v53 = vpop.permute.xlu0 %344 }
  0xb7   : > { %v409_v10 = vsel %vm278_vm0, %v803_v2, %v347_v52  ;;  %v408_v11 = vsel %vm278_vm0, %v802_v3, %v345_v53  ;;  %v829_v2 = vld [vmem:[%s1094_s24 + $0x1a8] sm:$0xff]  ;;  %v828_v3 = vld [vmem:[%s1094_s24 + $0x1a0] sm:$0xff] }
  0xba   : > { %v351_v54 = vpop.permute.xlu1 %350  ;;  %v349_v55 = vpop.permute.xlu0 %348 }
  0xbb   : > { %v411_v20 = vsel %vm278_vm0, %v805_v12, %v351_v54  ;;  %v410_v21 = vsel %vm278_vm0, %v804_v13, %v349_v55  ;;  %v849_v12 = vld [vmem:[%s1094_s24 + $0x248] sm:$0xff]  ;;  %v848_v13 = vld [vmem:[%s1094_s24 + $0x240] sm:$0xff] }
  0xbe   : > { %v367_v56 = vpop.permute.xlu1 %366  ;;  %v365_v57 = vpop.permute.xlu0 %364 }
  0xbf   : > { %v413_v4 = vsel %vm285_vm1, %v407_v0, %v367_v56  ;;  %v412_v5 = vsel %vm285_vm1, %v406_v1, %v365_v57  ;;  %v827_v56 = vld [vmem:[%s1094_s24 + $0x198] sm:$0xff]  ;;  %v826_v57 = vld [vmem:[%s1094_s24 + $0x190] sm:$0xff] }
  0xc2   : > { %v371_v58 = vpop.permute.xlu1 %370  ;;  %v369_v59 = vpop.permute.xlu0 %368 }
  0xc3   : > { %v415_v14 = vsel %vm285_vm1, %v409_v10, %v371_v58  ;;  %v414_v15 = vsel %vm285_vm1, %v408_v11, %v369_v59 }
  0xc6   : > { %v375_v62 = vpop.permute.xlu1 %374  ;;  %v373_v63 = vpop.permute.xlu0 %372 }
  0xc7   : > { %v417_v22 = vsel %vm285_vm1, %v411_v20, %v375_v62  ;;  %v416_v23 = vsel %vm285_vm1, %v410_v21, %v373_v63 }
  0xca   : > { %v391_v6 = vpop.permute.xlu1 %390  ;;  %v389_v7 = vpop.permute.xlu0 %388 }
  0xcb   : > { %v419_v8 = vsel %vm292_vm2, %v413_v4, %v391_v6  ;;  %v418_v9 = vsel %vm292_vm2, %v412_v5, %v389_v7 }
  0xcc   : > { %425 = vst.msk [vmem:[%s1251_s30 + $0x18] sm:$0xff] %vm299_vm3, %v419_v8  ;;  %424 = vst.msk [vmem:[%s1251_s30 + $0x10] sm:$0xff] %vm299_vm3, %v418_v9 }
  0xce   : > { %v395_v16 = vpop.permute.xlu1 %394  ;;  %v393_v17 = vpop.permute.xlu0 %392 }
  0xcf   : > { %v421_v18 = vsel %vm292_vm2, %v415_v14, %v395_v16  ;;  %v420_v19 = vsel %vm292_vm2, %v414_v15, %v393_v17 }
  0xd0   : > { %427 = vst.msk [vmem:[%s1251_s30 + $0x58] sm:$0xff] %vm299_vm3, %v421_v18  ;;  %426 = vst.msk [vmem:[%s1251_s30 + $0x50] sm:$0xff] %vm299_vm3, %v420_v19 }
  0xd2   : > { %v399_v24 = vpop.permute.xlu1 %398  ;;  %v397_v25 = vpop.permute.xlu0 %396 }
  0xd3   : > { %v423_v26 = vsel %vm292_vm2, %v417_v22, %v399_v24  ;;  %v422_v27 = vsel %vm292_vm2, %v416_v23, %v397_v25  ;;  %v851_v22 = vld [vmem:[%s1094_s24 + $0x258] sm:$0xff]  ;;  %v850_v23 = vld [vmem:[%s1094_s24 + $0x250] sm:$0xff] }
  0xd4   : > { %429 = vst.msk [vmem:[%s1251_s30 + $0x98] sm:$0xff] %vm299_vm3, %v423_v26  ;;  %428 = vst.msk [vmem:[%s1251_s30 + $0x90] sm:$0xff] %vm299_vm3, %v422_v27 }
  0xd6   : > { %v467_v28 = vpop.permute.xlu1 %466  ;;  %v465_v29 = vpop.permute.xlu0 %464 }
  0xd7   : > { %v531_v54 = vsel %vm278_vm0, %v825_v50, %v467_v28  ;;  %v530_v55 = vsel %vm278_vm0, %v824_v51, %v465_v29 }
  0xda   : > { %v471_v30 = vpop.permute.xlu1 %470  ;;  %v469_v31 = vpop.permute.xlu0 %468 }
  0xdb   : > { %v533_v0 = vsel %vm278_vm0, %v827_v56, %v471_v30  ;;  %v532_v1 = vsel %vm278_vm0, %v826_v57, %v469_v31 }
  0xde   : > { %v475_v32 = vpop.permute.xlu1 %474  ;;  %v473_v33 = vpop.permute.xlu0 %472 }
  0xdf   : > { %v535_v10 = vsel %vm278_vm0, %v829_v2, %v475_v32  ;;  %v534_v11 = vsel %vm278_vm0, %v828_v3, %v473_v33  ;;  %v853_v32 = vld [vmem:[%s1094_s24 + $0x268] sm:$0xff]  ;;  %v852_v33 = vld [vmem:[%s1094_s24 + $0x260] sm:$0xff] }
  0xe2   : > { %v591_v34 = vpop.permute.xlu1 %590  ;;  %v589_v35 = vpop.permute.xlu0 %588 }
  0xe3   : > { %v655_v20 = vsel %vm278_vm0, %v849_v12, %v591_v34  ;;  %v654_v21 = vsel %vm278_vm0, %v848_v13, %v589_v35 }
  0xe6   : > { %v1317_v36 = vpop.permute.xlu1 %594  ;;  %v1319_v37 = vpop.permute.xlu0 %592 }
  0xe7   : > { %v657_v30 = vsel %vm278_vm0, %v851_v22, %v1317_v36  ;;  %v656_v31 = vsel %vm278_vm0, %v850_v23, %v1319_v37 }
  0xea   : > { %v1321_v38 = vpop.permute.xlu1 %598  ;;  %v1323_v39 = vpop.permute.xlu0 %596 }
  0xeb   : > { %v659_v37 = vsel %vm278_vm0, %v853_v32, %v1321_v38 }
  0xee   : > { %v491_v40 = vpop.permute.xlu1 %490  ;;  %v489_v41 = vpop.permute.xlu0 %488 }
  0xef   : > { %v537_v58 = vsel %vm285_vm1, %v531_v54, %v491_v40  ;;  %v536_v59 = vsel %vm285_vm1, %v530_v55, %v489_v41 }
  0xf2   : > { %v495_v42 = vpop.permute.xlu1 %494  ;;  %v493_v43 = vpop.permute.xlu0 %492 }
  0xf3   : > { %v539_v4 = vsel %vm285_vm1, %v533_v0, %v495_v42  ;;  %v538_v5 = vsel %vm285_vm1, %v532_v1, %v493_v43  ;;  %v658_v43 = vsel %vm278_vm0, %v852_v33, %v1323_v39 }
  0xf6   : > { %v499_v44 = vpop.permute.xlu1 %498  ;;  %v497_v45 = vpop.permute.xlu0 %496 }
  0xf7   : > { %v541_v14 = vsel %vm285_vm1, %v535_v10, %v499_v44  ;;  %v540_v15 = vsel %vm285_vm1, %v534_v11, %v497_v45 }
  0xfa   : > { %v615_v46 = vpop.permute.xlu1 %614  ;;  %v613_v47 = vpop.permute.xlu0 %612 }
  0xfb   : > { %v661_v24 = vsel %vm285_vm1, %v655_v20, %v615_v46  ;;  %v660_v25 = vsel %vm285_vm1, %v654_v21, %v613_v47 }
  0xfe   : > { %v619_v48 = vpop.permute.xlu1 %618  ;;  %v617_v49 = vpop.permute.xlu0 %616 }
  0xff   : > { %v663_v34 = vsel %vm285_vm1, %v657_v30, %v619_v48  ;;  %v662_v35 = vsel %vm285_vm1, %v656_v31, %v617_v49 }
 0x102   : > { %v1327_v52 = vpop.permute.xlu1 %622  ;;  %v1329_v53 = vpop.permute.xlu0 %620 }
 0x103   : > { %v665_v44 = vsel %vm285_vm1, %v659_v37, %v1327_v52  ;;  %v664_v45 = vsel %vm285_vm1, %v658_v43, %v1329_v53 }
 0x106   : > { %v515_v60 = vpop.permute.xlu1 %514  ;;  %v513_v61 = vpop.permute.xlu0 %512 }
 0x107   : > { %v543_v62 = vsel %vm292_vm2, %v537_v58, %v515_v60  ;;  %v542_v63 = vsel %vm292_vm2, %v536_v59, %v513_v61 }
 0x108   : > { %549 = vst.msk [vmem:[%s1251_s30 + $0x28] sm:$0xff] %vm299_vm3, %v543_v62  ;;  %548 = vst.msk [vmem:[%s1251_s30 + $0x20] sm:$0xff] %vm299_vm3, %v542_v63 }
 0x10a   : > { %v519_v6 = vpop.permute.xlu1 %518  ;;  %v517_v7 = vpop.permute.xlu0 %516 }
 0x10b   : > { %v545_v8 = vsel %vm292_vm2, %v539_v4, %v519_v6  ;;  %v544_v9 = vsel %vm292_vm2, %v538_v5, %v517_v7 }
 0x10c   : > { %551 = vst.msk [vmem:[%s1251_s30 + $0x68] sm:$0xff] %vm299_vm3, %v545_v8  ;;  %550 = vst.msk [vmem:[%s1251_s30 + $0x60] sm:$0xff] %vm299_vm3, %v544_v9 }
 0x10e   : > { %v523_v16 = vpop.permute.xlu1 %522  ;;  %v521_v17 = vpop.permute.xlu0 %520 }
 0x10f   : > { %v547_v18 = vsel %vm292_vm2, %v541_v14, %v523_v16  ;;  %v546_v19 = vsel %vm292_vm2, %v540_v15, %v521_v17 }
 0x110   : > { %553 = vst.msk [vmem:[%s1251_s30 + $0xa8] sm:$0xff] %vm299_vm3, %v547_v18  ;;  %552 = vst.msk [vmem:[%s1251_s30 + $0xa0] sm:$0xff] %vm299_vm3, %v546_v19 }
 0x112   : > { %v639_v26 = vpop.permute.xlu1 %638  ;;  %v637_v27 = vpop.permute.xlu0 %636 }
 0x113   : > { %v667_v28 = vsel %vm292_vm2, %v661_v24, %v639_v26  ;;  %v666_v29 = vsel %vm292_vm2, %v660_v25, %v637_v27 }
 0x114   : > { %673 = vst.msk [vmem:[%s1251_s30 + $0x38] sm:$0xff] %vm299_vm3, %v667_v28  ;;  %672 = vst.msk [vmem:[%s1251_s30 + $0x30] sm:$0xff] %vm299_vm3, %v666_v29 }
 0x116   : > { %v643_v40 = vpop.permute.xlu1 %642  ;;  %v641_v41 = vpop.permute.xlu0 %640 }
 0x117   : > { %v669_v42 = vsel %vm292_vm2, %v663_v34, %v643_v40  ;;  %v668_v36 = vsel %vm292_vm2, %v662_v35, %v641_v41 }
 0x118   : > { %675 = vst.msk [vmem:[%s1251_s30 + $0x78] sm:$0xff] %vm299_vm3, %v669_v42  ;;  %674 = vst.msk [vmem:[%s1251_s30 + $0x70] sm:$0xff] %vm299_vm3, %v668_v36 }
 0x11a   : > { %v647_v38 = vpop.permute.xlu1 %646  ;;  %v645_v46 = vpop.permute.xlu0 %644 }
 0x11b   : > { %v671_v39 = vsel %vm292_vm2, %v665_v44, %v647_v38  ;;  %v670_v47 = vsel %vm292_vm2, %v664_v45, %v645_v46 }
 0x11c   : > { %677 = vst.msk [vmem:[%s1251_s30 + $0xb8] sm:$0xff] %vm299_vm3, %v671_v39  ;;  %676 = vst.msk [vmem:[%s1251_s30 + $0xb0] sm:$0xff] %vm299_vm3, %v670_v47 }
 0x11d   : > { %951 = shalt.err (!%p948_p5)
}
 0x11e   : > { %s952_s21 = scalar_lea.hbm %s1402_s9, 3072  ;;  %s956_s24 = scalar_lea.hbm %s1465_s1, 6144 }
 0x11f   : > { %p953_p6 = scmp.ne.s32.totalorder %s1402_s9, %s952_s21  ;;  %p957_p10 = scmp.lt.u32.totalorder %s1402_s9, %s1465_s1 }
 0x120   : > { %p958_p11 = scmp.lt.u32.totalorder %s956_s24, %s952_s21  ;;  %p960_p13 = scmp.lt.u32.totalorder %s952_s21, %s1402_s9 }
 0x121   : > { %p954_p7 = pnand %p953_p6, %p1074_p4 }
 0x122   : > { %p959_p12 = por %p958_p11, %p957_p10 }
 0x123   : > { %p955_p9 = pneg %p954_p7 }
 0x124   : > { %p961_p0 = por %p960_p13, %p959_p12 }
 0x126   : > { %p962_p1 = pnand %p961_p0, %p955_p9 }
 0x128   : > { %965 = shalt.err (!%p962_p1)
}
 0x129   : > { %s1022_s27 = smov 128   ;;  %s1023_s28 = smov 8  }
 0x12a   : > { %878 = dma.vmem_to_hbm [thread:$0]  (%p1074_p4), %s1404_s3, 3072, %s1402_s9, %s1418_s12, %s1022_s27, %s1022_s27, %s1023_s28  }
 0x12b PF: > { %p884_p2 = scmp.ge.s32.totalorder %s1016_s11, 2  ;;  %s709_s29 = sand.u32 1, %s996_s6  }
 0x12c   : > { %s710_s30 = scalar_lea.sflag [#allocation3], %s709_s29 }
 0x12d   : > { %p881_p3 = pnand %p884_p2, %p1081_p8 }
 0x12f   : > { %991 = dma.done.wait (!%p881_p3), %s710_s30, 3072  }
 0x130   : > { %993 = vsyncadd (!%p881_p3), %s710_s30, 4294964224  ;;  %s14_s11 = sadd.s32 1, %s1016_s11   ;;  %s1468_s6 = smov %s1000_s7 }
 0x131   : > { %p11_p5 = scmp.ge.s32.totalorder %s14_s11, 4   ;;  %s1469_s7 = smov %s1004_s8 }
 0x132   : > { %s1470_s8 = smov %s1087_s19  ;;  %s1471_s9 = smov %s1012_s10 }
 0x133   : > { %s1472_s10 = smov %s1474_s14  ;;  %13 = sbr.rel (!%p11_p5) target bundleno = 4 (0x4), region = 74 }
 0x13a   :  { %715 = vsyncpa [#allocation3], 1 }
 0x13b   :  { %717 = vsyncpa [#allocation3 + $0x1], 1 }

</bundles_post_ra>
